<compile_context>
chip_gen: v7x
topology: tpu7x:2x2x1
jax: 0.10.0
libtpu: 0.0.40
codegen_flags: <defaults>
</compile_context>

<pallas_src>
import math

import jax
import jax.numpy as jnp
from jax.experimental import pallas as pl
from jax.experimental.pallas import tpu as pltpu


def _round_up(x, m):
    return (x + m - 1) // m * m


def _cdiv(a, b):
    return (a + b - 1) // b


def _vmem_capacity_bytes():
    try:
        cap = getattr(pltpu.get_tpu_info(), "vmem_capacity_bytes", None)
        if cap:
            return int(cap)
    except Exception:
        pass
    return 64 << 20  # conservative fallback (v7x-sized VMEM)


def head_forward(x_nchw, fc_weight, fc_bias):
    """AdaptiveAvgPool2d(1) -> flatten -> Dropout(eval: identity) -> Linear.

    x_nchw: (N, C, H, W); fc_weight: (K, C); fc_bias: (K,).  Returns (N, K).
    """
    N, C, H, W = x_nchw.shape
    K = fc_weight.shape[0]
    HW = H * W
    out_dtype = x_nchw.dtype

    # Free metadata reshape (row-major): NCHW -> (N, C, HW).  No transpose and
    # no full-array pad of the activations.
    x = x_nchw.reshape(N, C, HW)

    x_isz = jnp.dtype(x.dtype).itemsize
    w_isz = jnp.dtype(fc_weight.dtype).itemsize
    o_isz = jnp.dtype(out_dtype).itemsize

    # f32 outputs accumulate directly in the (VMEM-resident) output block.
    use_scratch = out_dtype != jnp.float32

    # ---- K tiling (lane-dense; padding only touches the tiny weight/bias) --
    Kp = _round_up(K, 128)
    if Kp > 2048:                       # huge class counts: tile K
        TK = 2048
        Kp = _round_up(Kp, TK)
    else:
        TK = Kp
    grid_k = Kp // TK

    # ---- N tiling (minimize padding; TN must be multiple-of-8 or == N) -----
    if N <= 128:
        TN = N
    else:
        TN = min(128, _round_up(_cdiv(N, _cdiv(N, 128)), 8))
    grid_n = _cdiv(N, TN)

    # ---- Generation-aware VMEM budget ---------------------------------------
    vmem_cap = _vmem_capacity_bytes()
    vmem_limit = (vmem_cap * 3) // 4           # ~48 MiB on v7x, ~96 MiB on v5e/v6e
    tile_budget = vmem_limit - (4 << 20)       # headroom for compiler scratch

    def _usage(tn, tc, w_res):
        cw = _cdiv(C, tc) * tc
        u = 2 * tn * tc * HW * x_isz                    # x (double-buffered)
        u += 2 * (cw if w_res else tc) * TK * w_isz     # weight
        u += 2 * tn * TK * o_isz                        # out (double-buffered)
        if use_scratch:
            u += tn * TK * 4                            # f32 accumulator
        u += 2 * TK * 4                                 # bias
        return u

    tc_cands = [C] + [t for t in (4096, 2048, 1024, 512, 256, 128, 64, 32, 16, 8)
                      if t < C]

    TC = None
    w_resident = False
    while TC is None:
        for tc in tc_cands:
            if _usage(TN, tc, True) <= tile_budget:
                TC, w_resident = tc, True
                break
            if _usage(TN, tc, False) <= tile_budget:
                TC, w_resident = tc, False
                break
        if TC is not None:
            break
        if TN > 8:                                      # shrink the N tile (large HW)
            TN = max(8, _round_up(TN // 2, 8))
        else:                                           # accept the minimum config
            TC, w_resident = tc_cands[-1], False
    grid_n = _cdiv(N, TN)
    grid_c = _cdiv(C, TC)
    Cw = grid_c * TC
    needs_c_mask = (C % TC) != 0
    inv_hw = 1.0 / HW

    # ---- Tiny parameter arrays: transpose + zero-pad (cheap, never x) ------
    w_p = jnp.pad(fc_weight.T, ((0, Cw - C), (0, Kp - K)))
    b_p = jnp.pad(fc_bias.astype(jnp.float32), (0, Kp - K)).reshape(1, Kp)

    # ---- Kernel --------------------------------------------------------------
    def kernel(x_ref, w_ref, b_ref, o_ref, *scratch):
        acc_ref = scratch[0] if use_scratch else o_ref
        j = pl.program_id(1)
        c = pl.program_id(2)

        @pl.when(c == 0)
        def _init():
            acc_ref[...] = jnp.zeros_like(acc_ref)

        # Global average pool: spatial sum over the lane axis with f32
        # accumulation (the 1/(H*W) scale is applied once at finalize).
        pooled = jnp.sum(x_ref[...], axis=-1, dtype=jnp.float32)    # (TN, TC)
        if needs_c_mask:
            ch = c * TC + jax.lax.broadcasted_iota(jnp.int32, pooled.shape, 1)
            pooled = jnp.where(ch < C, pooled, 0.0)

        if w_resident:
            w_blk = w_ref[pl.ds(pl.multiple_of(c * TC, TC), TC), :]
        else:
            w_blk = w_ref[...]

        # Dropout is the identity at inference time.
        acc_ref[...] += jnp.dot(pooled.astype(w_blk.dtype), w_blk,
                                preferred_element_type=jnp.float32)

        @pl.when(c == pl.num_programs(2) - 1)
        def _finalize():
            o_ref[...] = (acc_ref[...] * inv_hw + b_ref[...]).astype(o_ref.dtype)

    if w_resident:
        w_spec = pl.BlockSpec((Cw, TK), lambda i, j, c: (0, j))
    else:
        w_spec = pl.BlockSpec((TC, TK), lambda i, j, c: (c, j))

    cost = pl.CostEstimate(
        flops=2 * N * Cw * Kp + N * C * HW,
        transcendentals=0,
        bytes_accessed=(grid_k * N * C * HW * x_isz
                        + (1 if w_resident else max(1, grid_n)) * Cw * Kp * w_isz
                        + N * Kp * o_isz),
    )

    out_p = pl.pallas_call(
        kernel,
        out_shape=jax.ShapeDtypeStruct((N, Kp), out_dtype),
        grid_spec=pltpu.PrefetchScalarGridSpec(
            num_scalar_prefetch=0,
            grid=(grid_n, grid_k, grid_c),
            in_specs=[
                pl.BlockSpec((TN, TC, HW), lambda i, j, c: (i, c, 0)),
                w_spec,
                pl.BlockSpec((1, TK), lambda i, j, c: (0, j)),
            ],
            out_specs=pl.BlockSpec((TN, TK), lambda i, j, c: (i, j)),
            scratch_shapes=([pltpu.VMEM((TN, TK), jnp.float32)]
                            if use_scratch else []),
        ),
        compiler_params=pltpu.CompilerParams(
            dimension_semantics=("parallel", "parallel", "arbitrary"),
            vmem_limit_bytes=int(vmem_limit),
        ),
        cost_estimate=cost,
    )(x, w_p, b_p)

    # Drop K padding outside the kernel (N is never padded).
    return out_p[:, :K]


if __name__ == "__main__":
    # Small shapes consistent with the module's forward.
    N, C, H, W = 2, 4, 16, 16
    num_classes = 8
    dropout_prob = 0.2  # unused at inference time (Dropout is identity in eval)

    key = jax.random.PRNGKey(0)
    kx, kw, kb = jax.random.split(key, 3)

    x = jax.random.normal(kx, (N, C, H, W), dtype=jnp.float32)

    # Deterministic Linear init matching nn.Linear's default U(-1/sqrt(C), 1/sqrt(C)).
    bound = 1.0 / math.sqrt(C)
    fc_weight = jax.random.uniform(kw, (num_classes, C), jnp.float32, -bound, bound)
    fc_bias = jax.random.uniform(kb, (num_classes,), jnp.float32, -bound, bound)

    out = jax.block_until_ready(head_forward(x, fc_weight, fc_bias))

    # Pure-JAX reference for sanity.
    ref = jnp.mean(x, axis=(2, 3)) @ fc_weight.T + fc_bias
    assert out.shape == (N, num_classes)
    assert jnp.allclose(out, ref, atol=1e-4, rtol=1e-5), "mismatch vs reference"

    print("KERNEL_OK")
</pallas_src>

<mosaic_0001>
module attributes {stable_mosaic.version = 11 : i64} {
  func.func @kernel(%arg0: i32, %arg1: i32, %arg2: i32, %arg3: memref<2x4x256xf32, #tpu.memory_space<vmem>>, %arg4: memref<4x128xf32, #tpu.memory_space<vmem>>, %arg5: memref<1x128xf32, #tpu.memory_space<vmem>>, %arg6: memref<2x128xf32, #tpu.memory_space<vmem>>) attributes {dimension_semantics = [#tpu.dimension_semantics<parallel>, #tpu.dimension_semantics<parallel>, #tpu.dimension_semantics<arbitrary>], iteration_bounds = array<i64: 1, 1, 1>, scalar_prefetch = 0 : i64, scratch_operands = 0 : i64, tpu.core_type = #tpu.core_type<tc>, window_params = [{transform_indices = @transform_0, window_bounds = array<i64: 2, 4, 256>}, {transform_indices = @transform_1, window_bounds = array<i64: 4, 128>}, {transform_indices = @transform_2, window_bounds = array<i64: 1, 128>}, {transform_indices = @transform_3, window_bounds = array<i64: 2, 128>}]} {
    %c0_i32 = arith.constant 0 : i32
    %0 = arith.cmpi eq, %arg2, %c0_i32 : i32
    %1 = arith.extui %0 : i1 to i32
    %c0_i32_0 = arith.constant 0 : i32
    %2 = arith.cmpi ne, %1, %c0_i32_0 : i32
    scf.if %2 {
      %cst_11 = arith.constant 0.000000e+00 : f32
      %16 = vector.broadcast %cst_11 : f32 to vector<2x128xf32>
      %c0_12 = arith.constant 0 : index
      %c0_13 = arith.constant 0 : index
      %17 = vector.load %arg6[%c0_12, %c0_13] : memref<2x128xf32, #tpu.memory_space<vmem>>, vector<2x128xf32>
      tpu.vector_store %arg6[%c0_12, %c0_13], %16 {strides = array<i32>} : memref<2x128xf32, #tpu.memory_space<vmem>>, vector<2x128xf32>,
    } else {
    }
    %c0 = arith.constant 0 : index
    %c0_1 = arith.constant 0 : index
    %c0_2 = arith.constant 0 : index
    %3 = vector.load %arg3[%c0, %c0_1, %c0_2] : memref<2x4x256xf32, #tpu.memory_space<vmem>>, vector<2x4x256xf32>
    %cst = arith.constant dense<0.000000e+00> : vector<2x4xf32>
    %4 = vector.multi_reduction <add>, %3, %cst [2] : vector<2x4x256xf32> to vector<2x4xf32>
    %c4_i32 = arith.constant 4 : i32
    %5 = arith.muli %arg2, %c4_i32 : i32
    %6 = tpu.assume_multiple %5, 4 : i32
    %7 = arith.index_cast %6 : i32 to index
    %c0_3 = arith.constant 0 : index
    %8 = vector.load %arg4[%7, %c0_3] : memref<4x128xf32, #tpu.memory_space<vmem>>, vector<4x128xf32>
    %c0_4 = arith.constant 0 : index
    %c0_5 = arith.constant 0 : index
    %9 = vector.load %arg6[%c0_4, %c0_5] : memref<2x128xf32, #tpu.memory_space<vmem>>, vector<2x128xf32>
    %cst_6 = arith.constant dense<0.000000e+00> : vector<2x128xf32>
    %10 = tpu.matmul %4, %8, %cst_6 {dimension_numbers = #tpu.dot_dimension_numbers<[1], [0], [0], [1], [0, 0, 1, 1], [], []>} : vector<2x4xf32>, vector<4x128xf32>, vector<2x128xf32> -> vector<2x128xf32>
    %11 = arith.addf %9, %10 : vector<2x128xf32>
    %c0_7 = arith.constant 0 : index
    %c0_8 = arith.constant 0 : index
    %12 = vector.load %arg6[%c0_7, %c0_8] : memref<2x128xf32, #tpu.memory_space<vmem>>, vector<2x128xf32>
    tpu.vector_store %arg6[%c0_7, %c0_8], %11 {strides = array<i32>} : memref<2x128xf32, #tpu.memory_space<vmem>>, vector<2x128xf32>,
    %c0_i32_9 = arith.constant 0 : i32
    %13 = arith.cmpi eq, %arg2, %c0_i32_9 : i32
    %14 = arith.extui %13 : i1 to i32
    %c0_i32_10 = arith.constant 0 : i32
    %15 = arith.cmpi ne, %14, %c0_i32_10 : i32
    scf.if %15 {
      %c0_11 = arith.constant 0 : index
      %c0_12 = arith.constant 0 : index
      %16 = vector.load %arg6[%c0_11, %c0_12] : memref<2x128xf32, #tpu.memory_space<vmem>>, vector<2x128xf32>
      %cst_13 = arith.constant 3.906250e-03 : f32
      %17 = vector.broadcast %cst_13 : f32 to vector<2x128xf32>
      %18 = arith.mulf %16, %17 : vector<2x128xf32>
      %c0_14 = arith.constant 0 : index
      %c0_15 = arith.constant 0 : index
      %19 = vector.load %arg5[%c0_14, %c0_15] : memref<1x128xf32, #tpu.memory_space<vmem>>, vector<1x128xf32>
      %20 = vector.broadcast %19 : vector<1x128xf32> to vector<2x128xf32>
      %21 = arith.addf %18, %20 : vector<2x128xf32>
      %c0_16 = arith.constant 0 : index
      %c0_17 = arith.constant 0 : index
      %22 = vector.load %arg6[%c0_16, %c0_17] : memref<2x128xf32, #tpu.memory_space<vmem>>, vector<2x128xf32>
      tpu.vector_store %arg6[%c0_16, %c0_17], %21 {strides = array<i32>} : memref<2x128xf32, #tpu.memory_space<vmem>>, vector<2x128xf32>,
    } else {
    }
    return
  }
  func.func @transform_0(%arg0: i32, %arg1: i32, %arg2: i32) -> (i32, i32, i32) {
    %c0_i32 = arith.constant 0 : i32
    %c0_i32_0 = arith.constant 0 : i32
    return %arg0, %arg2, %c0_i32 : i32, i32, i32
  }
  func.func @transform_1(%arg0: i32, %arg1: i32, %arg2: i32) -> (i32, i32) {
    %c0_i32 = arith.constant 0 : i32
    %c0_i32_0 = arith.constant 0 : i32
    return %c0_i32, %arg1 : i32, i32
  }
  func.func @transform_2(%arg0: i32, %arg1: i32, %arg2: i32) -> (i32, i32) {
    %c0_i32 = arith.constant 0 : i32
    %c0_i32_0 = arith.constant 0 : i32
    return %c0_i32, %arg1 : i32, i32
  }
  func.func @transform_3(%arg0: i32, %arg1: i32, %arg2: i32) -> (i32, i32) {
    %c0_i32 = arith.constant 0 : i32
    return %arg0, %arg1 : i32, i32
  }
}

</mosaic_0001>

<bundles_post_ra>
// kernel: tpu_custom_call.1
= control target key start
LH: loop header
LB: loop body
LE: loop exit
PB: predicated region body
PF: predicated region fallthrough
CT: control target
= control target key end

     0   :  { %8 = vsyncpa [#allocation3], 0  ;;  %s353_s0 = inlined_call_operand.hbm [shape: f32[2,4,256], index: 0, kind: input, shape index: {}]   ;;  %s354_s1 = inlined_call_operand.hbm [shape: f32[4,128], index: 1, kind: input, shape index: {}]   ;;  %s355_s2 = inlined_call_operand.vmem [shape: f32[1,128], index: 2, kind: input, shape index: {}]   ;;  %s356_s3 = inlined_call_operand.hbm [shape: f32[2,128], index: 3, kind: output, shape index: {}]  }
   0x1   :  { %9 = vsyncpa [#allocation6], 0 }
   0x2   :  { %10 = vsyncpa [#allocation4], 0  ;;  %s282_s12 = smov [#allocation2]   ;;  %s210_s16 = scalar_lea.hbm %s353_s0, 256 }
   0x3   :  { %s16_s13 = sshll.u32 %s282_s12, 4  ;;  %p211_p0 = scmp.ne.s32.totalorder %s353_s0, %s210_s16  ;;  %s17_s13 = int_to_ptr.vmem [resolvable:$true] %s16_s13 }
   0x4   :  { %p214_p1 = scmp.lt.u32.totalorder %s210_s16, %s353_s0 }
   0x6   :  { %p216_p2 = pnand %p214_p1, %p211_p0 }
   0x8   :  { %219 = shalt.err (!%p216_p2)
}
   0x9   :  { %s220_s21 = scalar_lea.vmem %s17_s13, 256  ;;  %p225_p4 = scmp.lt.s32.totalorder %s17_s13, %s17_s13 }
   0xa   :  { %p221_p3 = scmp.ne.s32.totalorder %s17_s13, %s220_s21  ;;  %p226_p5 = scmp.lt.s32.totalorder %s220_s21, %s220_s21 }
   0xc   :  { %p227_p6 = por %p226_p5, %p225_p4 }
   0xe   :  { %p228_p7 = pnand %p227_p6, %p221_p3 }
  0x10   :  { %231 = shalt.err (!%p228_p7)
}
  0x11   :  { %s283_s22 = smov 128   ;;  %s284_s23 = smov 8  }
  0x12   :  { %22 = dma.hbm_to_vmem [thread:$0]  %s353_s0, 256, %s17_s13, [#allocation3], %s283_s22, %s283_s22, %s284_s23  }
  0x13   :  { %s285_s26 = smov [#allocation5]   ;;  %s232_s30 = scalar_lea.hbm %s354_s1, 64 }
  0x14   :  { %s29_s27 = sshll.u32 %s285_s26, 4  ;;  %p233_p8 = scmp.ne.s32.totalorder %s354_s1, %s232_s30  ;;  %s30_s27 = int_to_ptr.vmem [resolvable:$true] %s29_s27 }
  0x15   :  { %p236_p9 = scmp.lt.u32.totalorder %s232_s30, %s354_s1 }
  0x17   :  { %p238_p10 = pnand %p236_p9, %p233_p8 }
  0x19   :  { %241 = shalt.err (!%p238_p10)
}
  0x1a   :  { %s242_s8 = scalar_lea.vmem %s30_s27, 64  ;;  %p247_p12 = scmp.lt.s32.totalorder %s30_s27, %s30_s27 }
  0x1b   :  { %p243_p11 = scmp.ne.s32.totalorder %s30_s27, %s242_s8  ;;  %p248_p13 = scmp.lt.s32.totalorder %s242_s8, %s242_s8 }
  0x1d   :  { %p249_p0 = por %p248_p13, %p247_p12 }
  0x1f   :  { %p250_p1 = pnand %p249_p0, %p243_p11 }
  0x21   :  { %253 = shalt.err (!%p250_p1)
}
  0x22   :  { %32 = dma.hbm_to_vmem [thread:$0]  %s354_s1, 64, %s30_s27, [#allocation6]  }
  0x23   :  { %276 = dma.done.wait [#allocation3], 256  }
  0x24   :  { %277 = vsyncadd [#allocation3], 4294967040 }
  0x25   :  { %278 = dma.done.wait [#allocation6], 64  }
  0x26   :  { %279 = vsyncadd [#allocation6], 4294967232  ;;  %vm54_vm0 = vcmask 1043456   ;;  %v46_v0 = vld [vmem:[#allocation2] sm:$0xff]  ;;  %v47_v1 = vld [vmem:[#allocation2 + $0x8] sm:$0xff]  ;;  %v286_v11 = vmov 0.0   ;;  %v71_v12 = vlaneseq }
  0x27   :  { %v50_v2 = vcombine.high %v46_v0, %v46_v0  ;;  %v55_v3 = vsel %vm54_vm0, %v46_v0, 0.0  ;;  %v51_v4 = vcombine.high %v47_v1, %v47_v1  ;;  %v60_v6 = vsel %vm54_vm0, %v47_v1, 0.0  ;;  %v67_v10 = vld [vmem:[#allocation5] sm:$0xf]  ;;  %45 = vst [vmem:[#allocation7] sm:$0x3] %v286_v11  ;;  %196 = vmatprep.subr.mxu0 %v286_v11 }
  0x28   :  { %vm287_vm1 = vmmov 0   ;;  %197 = vmatpush3.msk.msra.mxu0 %vm54_vm0, %v67_v10  ;;  %v72_v13 = vand.u32 127, %v71_v12  ;;  %v74_v14 = vshrl.u32 %v71_v12, 7  ;;  %vm81_vm2 = vcmask 1041409   ;;  %v193_v26 = vld [vmem:[%s355_s2] ss:$0 sm:$0xff] }
  0x29   :  { %v56_v5 = vsel %vm54_vm0, %v50_v2, 0.0  ;;  %v61_v7 = vsel %vm54_vm0, %v51_v4, 0.0  ;;  %198 = vmatprep.mubr.msk.f32.mxu0 %vm287_vm1, %v286_v11  ;;  %vm83_vm3 = vcmask 31744   ;;  %s288_s11 = smov [#allocation7]  }
  0x2a   :  { %v57_v8 = vadd.f32 %v56_v5, %v55_v3  ;;  %v62_v9 = vadd.f32 %v61_v7, %v60_v6  ;;  %v75_v16 = vsub.s32 %v72_v13, %v74_v14  ;;  %s181_s12 = sshll.u32 %s288_s11, 4  ;;  %s182_s12 = int_to_ptr.vmem [resolvable:$true] %s181_s12 }
  0x2b   :  { %s254_s13 = scalar_lea.vmem %s182_s12, 32  ;;  %p259_p3 = scmp.lt.s32.totalorder %s182_s12, %s182_s12 }
  0x2c   :  { %58 = vadd.xlane.f32.xlu0 %v57_v8  ;;  %p255_p2 = scmp.ne.s32.totalorder %s182_s12, %s254_s13  ;;  %p260_p4 = scmp.lt.s32.totalorder %s254_s13, %s254_s13 }
  0x2e   :  { %v68_v21 = vld [vmem:[#allocation7] sm:$0x3]  ;;  %p261_p5 = por %p260_p4, %p259_p3 }
  0x30   :  { %63 = vadd.xlane.f32.xlu0 %v62_v9  ;;  %p262_p6 = pnand %p261_p5, %p255_p2 }
  0xb9   :  { %v59_v15 = vpop.xlane.xlu0 %58 }
  0xba   :  { %v76_v18 = vrot.slane %v59_v15, %v75_v16 }
  0xbd   :  { %v64_v17 = vpop.xlane.xlu0 %63 }
  0xbe   :  { %v80_v19 = vrot.slane %v64_v17, %v75_v16 }
  0xc0   :  { %v82_v20 = vsel %vm81_vm2, %v80_v19, %v76_v18 }
  0xc1   :  { %199 = vmatmul.mubr.msk.f32.vlgmr.msra.gmra.mrb[0].mxu0 %vm83_vm3, %v82_v20 }
 0x194   :  { %v155_v22 = vpop.f32.mrb[0].mxu0 }
 0x195   :  { %v159_v23 = vadd.f32 %v155_v22, %v68_v21  ;;  %v200_v24 = vpop.f32.mrb[1].mxu0 }
 0x197   :  { %160 = vst [vmem:[#allocation7] sm:$0x3] %v159_v23 }
 0x19e   :  { %v164_v25 = vld [vmem:[#allocation7] sm:$0x3] }
 0x19f   :  { %v165_v27 = vmul.f32 0.00390625, %v164_v25 }
 0x1a1   :  { %v173_v28 = vadd.f32 %v193_v26, %v165_v27 }
 0x1a3   :  { %174 = vst [vmem:[#allocation7] sm:$0x3] %v173_v28 }
 0x1a4   :  { %265 = shalt.err (!%p262_p6)
}
 0x1a5   :  { %s266_s16 = scalar_lea.hbm %s356_s3, 32 }
 0x1a6   :  { %p267_p7 = scmp.ne.s32.totalorder %s356_s3, %s266_s16  ;;  %p270_p8 = scmp.lt.u32.totalorder %s266_s16, %s356_s3 }
 0x1a8   :  { %p272_p9 = pnand %p270_p8, %p267_p7 }
 0x1aa   :  { %275 = shalt.err (!%p272_p9)
}
 0x1ab   :  { %184 = dma.vmem_to_hbm [thread:$0]  %s182_s12, 32, %s356_s3, [#allocation4]  }
 0x1ac   :  { %280 = dma.done.wait [#allocation4], 32  }
 0x1ad   :  { %281 = vsyncadd [#allocation4], 4294967264 }
 0x1ae   :  { %188 = vsyncpa [#allocation3], 1 }
 0x1af   :  { %189 = vsyncpa [#allocation6], 1 }
 0x1b0   :  { %190 = vsyncpa [#allocation4], 1 }

</bundles_post_ra>
